<compile_context>
chip_gen: v6e
topology: v6e:2x2x1
jax: 0.10.0
libtpu: 0.0.40
codegen_flags: <defaults>
</compile_context>

<pallas_src>
import jax
import jax.numpy as jnp
import numpy as np
from jax.experimental import pallas as pl
from jax.experimental.pallas import tpu as pltpu


def _round_up(x: int, m: int) -> int:
    return ((x + m - 1) // m) * m


def _make_kernel(tb, n_b2, row_limit, needs_row_mask):
    """Grid = (split, feature_tiles, batch_tiles); axis 2 is the reduction axis."""

    def kernel(pred_ref, targ_ref, mask_ref, sq_ref, cnt_ref):
        b = pl.program_id(2)

        @pl.when(b == 0)
        def _():
            sq_ref[...] = jnp.zeros_like(sq_ref)
            cnt_ref[...] = jnp.zeros_like(cnt_ref)

        # Per-tile upcast (inputs stay bf16/f32 in HBM; accumulation is f32).
        pred = pred_ref[...].astype(jnp.float32)          # [tb, tt]
        targ = targ_ref[...].astype(jnp.float32)          # [tb, tt]

        valid = jnp.logical_not(jnp.isnan(targ))          # [tb, tt] bool
        validf = valid.astype(jnp.float32)

        # Matches y_pred * mask - y_true.masked_fill(~mask, 0): a NaN prediction at a
        # masked (NaN-target) position still propagates, like the PyTorch original.
        err = pred * validf - jnp.where(valid, targ, 0.0)
        sq = err * err
        cnt = validf

        if needs_row_mask:
            # Neutralize out-of-bounds rows of the last (partial) batch tile in-kernel
            # instead of padding inputs in the wrapper (garbage rows could be NaN/Inf).
            s = pl.program_id(0)
            row0 = (s * n_b2 + b) * tb
            rows = jax.lax.broadcasted_iota(jnp.int32, sq.shape, 0) + row0
            row_ok = rows < row_limit
            sq = jnp.where(row_ok, sq, 0.0)
            cnt = jnp.where(row_ok, cnt, 0.0)

        sq_ref[...] += jnp.sum(sq, axis=0, keepdims=True)[None]    # [1, 1, tt]
        cnt_ref[...] += jnp.sum(cnt, axis=0, keepdims=True)[None]  # [1, 1, tt]

        # int8 mask: full (tb, tt) VMEM store; ragged edges handled by the writeback DMA.
        mask_ref[...] = valid.astype(jnp.int8)

    return kernel


class NaNTolerantMSELossPallas:
    """JAX/Pallas port of NaNTolerantMSELoss. Returns (dim_means f32[T], mask bool[B, T])."""

    def __init__(self, block_b: int = 512, block_t: int = 512):
        # int8 mask tiles need the sublane tile to be a multiple of 32 (or full-B).
        self.block_b = max(32, _round_up(int(block_b), 32))
        # lane tile must be a multiple of 128 (or the full feature dim).
        self.block_t = max(128, (int(block_t) // 128) * 128)

    def __call__(self, y_pred, y_true):
        assert y_pred.shape == y_true.shape, \
            "Predictions and targets must have the same shape"
        B, T = y_pred.shape

        # ---- small-T lane packing: row-major [B, T] -> [B//g, g*T] ----
        g = 1
        if T < 128 and B > 1:
            for cand in range(min(max(1, 128 // T), B), 1, -1):
                if B % cand == 0:
                    g = cand
                    break
        B_k, T_k = B // g, g * T
        pred_k = y_pred.reshape(B_k, T_k) if g > 1 else y_pred
        true_k = y_true.reshape(B_k, T_k) if g > 1 else y_true

        # ---- tiling (cap tiles; never pad inputs in the wrapper) ----
        tt = T_k if T_k <= self.block_t else self.block_t
        n_t = pl.cdiv(T_k, tt)
        tb = B_k if B_k <= self.block_b else self.block_b
        n_b = pl.cdiv(B_k, tb)
        needs_row_mask = (B_k % tb) != 0

        # 2-way parallel split of the batch reduction when there is only one feature
        # tile, so v7x's two TensorCores both get work (no-op on v5e/v6e).
        n_s = 2 if (n_t == 1 and n_b >= 2 and n_b % 2 == 0) else 1
        n_b2 = n_b // n_s
        grid = (n_s, n_t, n_b2)

        tile_map = lambda s, t, b: (s * n_b2 + b, t)
        acc_map = lambda s, t, b: (s, 0, t)

        in_bytes = pred_k.dtype.itemsize + true_k.dtype.itemsize + 1  # + int8 mask
        vmem_limit = int(min(64 * 1024 * 1024,
                             max(16 * 1024 * 1024, 4 * tb * tt * in_bytes)))

        mask_i8, sq_part, cnt_part = pl.pallas_call(
            _make_kernel(tb, n_b2, B_k, needs_row_mask),
            out_shape=(
                jax.ShapeDtypeStruct((B_k, T_k), jnp.int8),         # mask (int8)
                jax.ShapeDtypeStruct((n_s, 1, T_k), jnp.float32),   # partial sq-err sums
                jax.ShapeDtypeStruct((n_s, 1, T_k), jnp.float32),   # partial valid counts
            ),
            grid_spec=pltpu.PrefetchScalarGridSpec(
                num_scalar_prefetch=0,
                grid=grid,
                in_specs=[
                    pl.BlockSpec((tb, tt), tile_map),       # y_pred (native dtype)
                    pl.BlockSpec((tb, tt), tile_map),       # y_true (native dtype)
                ],
                out_specs=(
                    pl.BlockSpec((tb, tt), tile_map),       # mask
                    pl.BlockSpec((1, 1, tt), acc_map),      # sq  (resident over axis 2)
                    pl.BlockSpec((1, 1, tt), acc_map),      # cnt (resident over axis 2)
                ),
            ),
            compiler_params=pltpu.CompilerParams(
                dimension_semantics=("parallel", "parallel", "arbitrary"),
                vmem_limit_bytes=vmem_limit),
        )(pred_k, true_k)

        # Fold the split axis and the lane-packing groups, then clamp + divide.
        # TODO(synk): for B in the millions, consider f64 here / compensated summation.
        sq_tot = sq_part.reshape(-1, T).sum(axis=0)          # [T] f32
        cnt_tot = cnt_part.reshape(-1, T).sum(axis=0)        # [T] f32
        dim_means = sq_tot / jnp.maximum(cnt_tot, 1.0)       # clamp(min=1)
        mask = mask_i8.reshape(B, T).astype(jnp.bool_)
        return dim_means, mask


# ----------------------------- reference + tests -----------------------------

def _reference(y_pred, y_true):
    """NumPy (float64) translation of the PyTorch forward."""
    p = np.asarray(y_pred).astype(np.float64)
    t = np.asarray(y_true).astype(np.float64)
    m = ~np.isnan(t)
    n_valid = np.maximum(m.sum(axis=0), 1)
    sq = (p * m - np.where(m, t, 0.0)) ** 2
    return sq.sum(axis=0) / n_valid, m


def _run_and_check(loss_fn, y_pred, y_true, rtol=1e-5, atol=1e-6):
    dim_means, mask = loss_fn(y_pred, y_true)
    jax.block_until_ready((dim_means, mask))
    ref_means, ref_mask = _reference(y_pred, y_true)
    np.testing.assert_allclose(np.asarray(dim_means, np.float64), ref_means,
                               rtol=rtol, atol=atol)
    assert np.array_equal(np.asarray(mask), ref_mask)


if __name__ == "__main__":
    key = jax.random.PRNGKey(0)
    loss = NaNTolerantMSELossPallas()

    # case 1: tiny multi-task shape -> lane packing (g=8); fully-NaN column (clamp path)
    B, T = 8, 4
    k1, k2 = jax.random.split(key)
    y_pred = jax.random.normal(k1, (B, T), dtype=jnp.float32)
    y_true = jax.random.normal(k2, (B, T), dtype=jnp.float32)
    y_true = y_true.at[1, 0].set(jnp.nan)
    y_true = y_true.at[3, :].set(jnp.nan)
    y_true = y_true.at[:, 2].set(jnp.nan)      # fully-NaN column -> n_valid clamp(min=1)
    _run_and_check(loss, y_pred, y_true)

    # case 2: ragged B with no lane-packing divisor (g=1), single full-dim block
    B2, T2 = 37, 6
    k3, k4, k5 = jax.random.split(jax.random.PRNGKey(1), 3)
    y_pred2 = jax.random.normal(k3, (B2, T2), dtype=jnp.float32)
    y_true2 = jnp.where(jax.random.bernoulli(k5, 0.3, (B2, T2)),
                        jnp.float32(jnp.nan),
                        jax.random.normal(k4, (B2, T2), dtype=jnp.float32))
    _run_and_check(loss, y_pred2, y_true2)

    # case 3: feature tiling + ragged batch tiles (in-kernel row mask, no padding pass)
    B3, T3 = 40, 256
    k6, k7, k8 = jax.random.split(jax.random.PRNGKey(2), 3)
    y_pred3 = jax.random.normal(k6, (B3, T3), dtype=jnp.float32)
    y_true3 = jnp.where(jax.random.bernoulli(k8, 0.2, (B3, T3)),
                        jnp.float32(jnp.nan),
                        jax.random.normal(k7, (B3, T3), dtype=jnp.float32))
    _run_and_check(NaNTolerantMSELossPallas(block_b=32, block_t=128), y_pred3, y_true3)

    # case 4: single feature tile + even batch-tile count -> 2-way parallel split (v7x)
    B4, T4 = 64, 200
    k9, k10, k11 = jax.random.split(jax.random.PRNGKey(3), 3)
    y_pred4 = jax.random.normal(k9, (B4, T4), dtype=jnp.float32)
    y_true4 = jnp.where(jax.random.bernoulli(k11, 0.25, (B4, T4)),
                        jnp.float32(jnp.nan),
                        jax.random.normal(k10, (B4, T4), dtype=jnp.float32))
    _run_and_check(NaNTolerantMSELossPallas(block_b=32), y_pred4, y_true4)

    # case 5: native bf16 inputs (no wrapper upcast; per-tile upcast inside the kernel)
    B5, T5 = 24, 16
    k12, k13, k14 = jax.random.split(jax.random.PRNGKey(4), 3)
    y_pred5 = jax.random.normal(k12, (B5, T5), dtype=jnp.bfloat16)
    y_true5 = jnp.where(jax.random.bernoulli(k14, 0.3, (B5, T5)),
                        jnp.array(jnp.nan, dtype=jnp.bfloat16),
                        jax.random.normal(k13, (B5, T5), dtype=jnp.bfloat16))
    _run_and_check(loss, y_pred5, y_true5, rtol=1e-4, atol=1e-5)

    print("KERNEL_OK")
</pallas_src>

<mosaic_0001>
module attributes {stable_mosaic.version = 11 : i64} {
  func.func @kernel(%arg0: i32, %arg1: i32, %arg2: i32, %arg3: memref<1x32xf32, #tpu.memory_space<vmem>>, %arg4: memref<1x32xf32, #tpu.memory_space<vmem>>, %arg5: memref<1x32xi8, #tpu.memory_space<vmem>>, %arg6: memref<1x1x32xf32, #tpu.memory_space<vmem>>, %arg7: memref<1x1x32xf32, #tpu.memory_space<vmem>>) attributes {dimension_semantics = [#tpu.dimension_semantics<parallel>, #tpu.dimension_semantics<parallel>, #tpu.dimension_semantics<arbitrary>], iteration_bounds = array<i64: 1, 1, 1>, scalar_prefetch = 0 : i64, scratch_operands = 0 : i64, tpu.core_type = #tpu.core_type<tc>, window_params = [{transform_indices = @transform_0, window_bounds = array<i64: 1, 32>}, {transform_indices = @transform_1, window_bounds = array<i64: 1, 32>}, {transform_indices = @transform_2, window_bounds = array<i64: 1, 32>}, {transform_indices = @transform_3, window_bounds = array<i64: 1, 1, 32>}, {transform_indices = @transform_4, window_bounds = array<i64: 1, 1, 32>}]} {
    %c0_i32 = arith.constant 0 : i32
    %0 = arith.cmpi eq, %arg2, %c0_i32 : i32
    %1 = arith.extui %0 : i1 to i32
    %c0_i32_0 = arith.constant 0 : i32
    %2 = arith.cmpi ne, %1, %c0_i32_0 : i32
    scf.if %2 {
      %cst_21 = arith.constant 0.000000e+00 : f32
      %28 = vector.broadcast %cst_21 : f32 to vector<1x1x32xf32>
      %c0_22 = arith.constant 0 : index
      %c0_23 = arith.constant 0 : index
      %c0_24 = arith.constant 0 : index
      %29 = vector.load %arg6[%c0_22, %c0_23, %c0_24] : memref<1x1x32xf32, #tpu.memory_space<vmem>>, vector<1x1x32xf32>
      tpu.vector_store %arg6[%c0_22, %c0_23, %c0_24], %28 {strides = array<i32>} : memref<1x1x32xf32, #tpu.memory_space<vmem>>, vector<1x1x32xf32>,
      %cst_25 = arith.constant 0.000000e+00 : f32
      %30 = vector.broadcast %cst_25 : f32 to vector<1x1x32xf32>
      %c0_26 = arith.constant 0 : index
      %c0_27 = arith.constant 0 : index
      %c0_28 = arith.constant 0 : index
      %31 = vector.load %arg7[%c0_26, %c0_27, %c0_28] : memref<1x1x32xf32, #tpu.memory_space<vmem>>, vector<1x1x32xf32>
      tpu.vector_store %arg7[%c0_26, %c0_27, %c0_28], %30 {strides = array<i32>} : memref<1x1x32xf32, #tpu.memory_space<vmem>>, vector<1x1x32xf32>,
    } else {
    }
    %c0 = arith.constant 0 : index
    %c0_1 = arith.constant 0 : index
    %3 = vector.load %arg3[%c0, %c0_1] : memref<1x32xf32, #tpu.memory_space<vmem>>, vector<1x32xf32>
    %c0_2 = arith.constant 0 : index
    %c0_3 = arith.constant 0 : index
    %4 = vector.load %arg4[%c0_2, %c0_3] : memref<1x32xf32, #tpu.memory_space<vmem>>, vector<1x32xf32>
    %5 = arith.cmpf one, %4, %4 : vector<1x32xf32>
    %cst = arith.constant dense<true> : vector<1x32xi1>
    %6 = arith.xori %5, %cst : vector<1x32xi1>
    %7 = arith.extui %6 : vector<1x32xi1> to vector<1x32xi32>
    %8 = arith.sitofp %7 : vector<1x32xi32> to vector<1x32xf32>
    %9 = arith.mulf %3, %8 : vector<1x32xf32>
    %cst_4 = arith.constant 0.000000e+00 : f32
    %10 = vector.broadcast %cst_4 : f32 to vector<1x32xf32>
    %11 = arith.select %6, %4, %10 : vector<1x32xi1>, vector<1x32xf32>
    %12 = arith.subf %9, %11 : vector<1x32xf32>
    %13 = arith.mulf %12, %12 : vector<1x32xf32>
    %c0_5 = arith.constant 0 : index
    %c0_6 = arith.constant 0 : index
    %c0_7 = arith.constant 0 : index
    %14 = vector.load %arg6[%c0_5, %c0_6, %c0_7] : memref<1x1x32xf32, #tpu.memory_space<vmem>>, vector<1x1x32xf32>
    %cst_8 = arith.constant dense<0.000000e+00> : vector<32xf32>
    %15 = vector.multi_reduction <add>, %13, %cst_8 [0] : vector<1x32xf32> to vector<32xf32>
    %16 = vector.shape_cast %15 : vector<32xf32> to vector<1x32xf32>
    %17 = vector.shape_cast %16 : vector<1x32xf32> to vector<1x1x32xf32>
    %18 = arith.addf %14, %17 : vector<1x1x32xf32>
    %c0_9 = arith.constant 0 : index
    %c0_10 = arith.constant 0 : index
    %c0_11 = arith.constant 0 : index
    %19 = vector.load %arg6[%c0_9, %c0_10, %c0_11] : memref<1x1x32xf32, #tpu.memory_space<vmem>>, vector<1x1x32xf32>
    tpu.vector_store %arg6[%c0_9, %c0_10, %c0_11], %18 {strides = array<i32>} : memref<1x1x32xf32, #tpu.memory_space<vmem>>, vector<1x1x32xf32>,
    %c0_12 = arith.constant 0 : index
    %c0_13 = arith.constant 0 : index
    %c0_14 = arith.constant 0 : index
    %20 = vector.load %arg7[%c0_12, %c0_13, %c0_14] : memref<1x1x32xf32, #tpu.memory_space<vmem>>, vector<1x1x32xf32>
    %cst_15 = arith.constant dense<0.000000e+00> : vector<32xf32>
    %21 = vector.multi_reduction <add>, %8, %cst_15 [0] : vector<1x32xf32> to vector<32xf32>
    %22 = vector.shape_cast %21 : vector<32xf32> to vector<1x32xf32>
    %23 = vector.shape_cast %22 : vector<1x32xf32> to vector<1x1x32xf32>
    %24 = arith.addf %20, %23 : vector<1x1x32xf32>
    %c0_16 = arith.constant 0 : index
    %c0_17 = arith.constant 0 : index
    %c0_18 = arith.constant 0 : index
    %25 = vector.load %arg7[%c0_16, %c0_17, %c0_18] : memref<1x1x32xf32, #tpu.memory_space<vmem>>, vector<1x1x32xf32>
    tpu.vector_store %arg7[%c0_16, %c0_17, %c0_18], %24 {strides = array<i32>} : memref<1x1x32xf32, #tpu.memory_space<vmem>>, vector<1x1x32xf32>,
    %26 = arith.extui %6 : vector<1x32xi1> to vector<1x32xi8>
    %c0_19 = arith.constant 0 : index
    %c0_20 = arith.constant 0 : index
    %27 = vector.load %arg5[%c0_19, %c0_20] : memref<1x32xi8, #tpu.memory_space<vmem>>, vector<1x32xi8>
    tpu.vector_store %arg5[%c0_19, %c0_20], %26 {strides = array<i32>} : memref<1x32xi8, #tpu.memory_space<vmem>>, vector<1x32xi8>,
    return
  }
  func.func @transform_0(%arg0: i32, %arg1: i32, %arg2: i32) -> (i32, i32) {
    %c1_i32 = arith.constant 1 : i32
    %0 = arith.muli %arg0, %c1_i32 : i32
    %1 = arith.addi %0, %arg2 : i32
    %c0_i32 = arith.constant 0 : i32
    return %1, %arg1 : i32, i32
  }
  func.func @transform_1(%arg0: i32, %arg1: i32, %arg2: i32) -> (i32, i32) {
    %c1_i32 = arith.constant 1 : i32
    %0 = arith.muli %arg0, %c1_i32 : i32
    %1 = arith.addi %0, %arg2 : i32
    %c0_i32 = arith.constant 0 : i32
    return %1, %arg1 : i32, i32
  }
  func.func @transform_2(%arg0: i32, %arg1: i32, %arg2: i32) -> (i32, i32) {
    %c1_i32 = arith.constant 1 : i32
    %0 = arith.muli %arg0, %c1_i32 : i32
    %1 = arith.addi %0, %arg2 : i32
    %c0_i32 = arith.constant 0 : i32
    return %1, %arg1 : i32, i32
  }
  func.func @transform_3(%arg0: i32, %arg1: i32, %arg2: i32) -> (i32, i32, i32) {
    %c0_i32 = arith.constant 0 : i32
    %c0_i32_0 = arith.constant 0 : i32
    return %arg0, %c0_i32, %arg1 : i32, i32, i32
  }
  func.func @transform_4(%arg0: i32, %arg1: i32, %arg2: i32) -> (i32, i32, i32) {
    %c0_i32 = arith.constant 0 : i32
    %c0_i32_0 = arith.constant 0 : i32
    return %arg0, %c0_i32, %arg1 : i32, i32, i32
  }
}

</mosaic_0001>

<bundles_post_ra>
// kernel: tpu_custom_call.1
= control target key start
LH: loop header
LB: loop body
LE: loop exit
PB: predicated region body
PF: predicated region fallthrough
CT: control target
= control target key end

     0   :  { %10 = vsyncpa [#allocation3], 0  ;;  %s279_s0 = inlined_call_operand.hbm [shape: f32[1,32], index: 0, kind: input, shape index: {}]   ;;  %s280_s1 = inlined_call_operand.vmem [shape: f32[1,32], index: 1, kind: input, shape index: {}]   ;;  %s281_s2 = inlined_call_operand.hbm [shape: s8[1,32], index: 2, kind: output, shape index: {0}]   ;;  %s282_s3 = inlined_call_operand.hbm [shape: f32[1,1,32], index: 3, kind: output, shape index: {1}]   ;;  %s283_s4 = inlined_call_operand.hbm [shape: f32[1,1,32], index: 4, kind: output, shape index: {2}]  }
   0x1   :  { %11 = vsyncpa [#allocation4], 0 }
   0x2   :  { %12 = vsyncpa [#allocation7], 0  ;;  %s227_s15 = smov [#allocation2]  }
   0x3   :  { %s22_s16 = sshll.u32 %s227_s15, 4  ;;  %s23_s16 = int_to_ptr.vmem [resolvable:$true] %s22_s16 }
   0x4   :  { %s149_s17 = scalar_lea.vmem %s23_s16, 16  ;;  %s153_s18 = scalar_lea.vmem %s23_s16, 32 }
   0x5   :  { %p150_p0 = scmp.ne.s32.totalorder %s23_s16, %s149_s17  ;;  %p154_p1 = scmp.lt.s32.totalorder %s23_s16, %s23_s16 }
   0x6   :  { %p155_p2 = scmp.lt.s32.totalorder %s153_s18, %s149_s17 }
   0x8   :  { %p156_p3 = por %p155_p2, %p154_p1 }
   0xa   :  { %p157_p4 = pnand %p156_p3, %p150_p0 }
   0xc   :  { %160 = shalt.err (!%p157_p4)
}
   0xd   :  { %25 = dma.hbm_to_vmem [thread:$0]  %s279_s0, 16, %s23_s16, [#allocation3]  }
   0xe   :  { %221 = dma.done.wait [#allocation3], 16  }
   0xf   :  { %222 = vsyncadd [#allocation3], 4294967280  ;;  %vm53_vm0 = vcmask 253952   ;;  %v228_v0 = vmov 0.0   ;;  %v57_v1 = vld [vmem:[%s280_s1] sm:$0x1] }
  0x10   :  { %54 = vst.msk [vmem:[#allocation6] sm:$0x1] %vm53_vm0, %v228_v0  ;;  %55 = vst.msk [vmem:[#allocation8] sm:$0x1] %vm53_vm0, %v228_v0  ;;  %v56_v2 = vld [vmem:[#allocation2] sm:$0x1]  ;;  %vm58_vm1 = vcmp.ne.f32.partialorder %v57_v1, %v57_v1 }
  0x11   :  { %vm229_vm2 = vmmov 1   ;;  %v230_v6 = vmov 0   ;;  %vm80_vm4 = vsmask.f32 0  ;;  %s231_s0 = smov [#allocation5]   ;;  %s232_s1 = smov [#allocation6]  }
  0x12   :  { %vm59_vm3 = vmxor %vm58_vm1, %vm229_vm2  ;;  %s94_s23 = sshll.u32 %s231_s0, 4  ;;  %v82_v14 = vld [vmem:[#allocation5] sm:$0x1]  ;;  %s104_s24 = sshll.u32 %s232_s1, 4  ;;  %s95_s23 = int_to_ptr.vmem [resolvable:$true] %s94_s23  ;;  %s105_s24 = int_to_ptr.vmem [resolvable:$true] %s104_s24 }
  0x13   :  { %v133_v4 = vsel %vm59_vm3, 1.0, %v228_v0  ;;  %v63_v5 = vsel %vm59_vm3, %v57_v1, 0.0  ;;  %v60_v7 = vsel %vm59_vm3, 1, %v230_v6  ;;  %vm81_vm5 = vmand %vm53_vm0, %vm80_vm4  ;;  %s233_s25 = smov [#allocation8]   ;;  %s161_s27 = scalar_lea.vmem %s95_s23, 16 }
  0x14   :  { %v62_v8 = vmul.f32 %v133_v4, %v56_v2  ;;  %v75_v10 = vpack.c.b16 %v60_v7, %v60_v7  ;;  %s114_s26 = sshll.u32 %s233_s25, 4  ;;  %p162_p5 = scmp.ne.s32.totalorder %s95_s23, %s161_s27  ;;  %s115_s26 = int_to_ptr.vmem [resolvable:$true] %s114_s26 }
  0x15   :  { %s165_s28 = scalar_lea.vmem %s95_s23, 32  ;;  %p166_p6 = scmp.lt.s32.totalorder %s95_s23, %s95_s23 }
  0x16   :  { %v64_v11 = vsub.f32 %v62_v8, %v63_v5  ;;  %v76_v12 = vpack.c.b8 %v75_v10, %v75_v10  ;;  %p167_p7 = scmp.lt.s32.totalorder %s165_s28, %s161_s27 }
  0x17   :  { %v71_v3 = vld [vmem:[#allocation8] sm:$0x1]  ;;  %v66_v13 = vld [vmem:[#allocation6] sm:$0x1] }
  0x18   :  { %v73_v9 = vadd.f32 %v133_v4, %v71_v3  ;;  %v65_v15 = vmul.f32 %v64_v11, %v64_v11  ;;  %vm77_vm6 = vnez %v76_v12  ;;  %p168_p8 = por %p167_p7, %p166_p6 }
  0x19   :  { %v78_v16 = vsel %vm77_vm6, 16843009, %v230_v6 }
  0x1a   :  { %74 = vst.msk [vmem:[#allocation8] sm:$0x1] %vm53_vm0, %v73_v9  ;;  %v68_v17 = vadd.f32 %v66_v13, %v65_v15  ;;  %v83_v18 = vsel %vm81_vm5, %v78_v16, %v82_v14  ;;  %p169_p9 = pnand %p168_p8, %p162_p5 }
  0x1b   :  { %84 = vst [vmem:[#allocation5] sm:$0x1] %v83_v18 }
  0x1c   :  { %70 = vst.msk [vmem:[#allocation6] sm:$0x1] %vm53_vm0, %v68_v17 }
  0x1d   :  { %172 = shalt.err (!%p169_p9)
}
  0x1e   :  { %97 = dma.vmem_to_hbm [thread:$0]  %s95_s23, 16, %s281_s2, [#allocation4]  }
  0x1f   :  { %s181_s5 = scalar_lea.vmem %s105_s24, 16  ;;  %s185_s6 = scalar_lea.vmem %s105_s24, 32 }
  0x20   :  { %p182_p10 = scmp.ne.s32.totalorder %s105_s24, %s181_s5  ;;  %p186_p11 = scmp.lt.s32.totalorder %s105_s24, %s105_s24 }
  0x21   :  { %p187_p12 = scmp.lt.s32.totalorder %s185_s6, %s181_s5 }
  0x23   :  { %p188_p13 = por %p187_p12, %p186_p11 }
  0x25   :  { %p189_p0 = pnand %p188_p13, %p182_p10 }
  0x27   :  { %192 = shalt.err (!%p189_p0)
}
  0x28   :  { %107 = dma.vmem_to_hbm [thread:$0]  %s105_s24, 16, %s282_s3, [#allocation7]  }
  0x29   :  { %s201_s9 = scalar_lea.vmem %s115_s26, 16  ;;  %s205_s10 = scalar_lea.vmem %s115_s26, 32 }
  0x2a   :  { %p202_p1 = scmp.ne.s32.totalorder %s115_s26, %s201_s9  ;;  %p206_p2 = scmp.lt.s32.totalorder %s115_s26, %s115_s26 }
  0x2b   :  { %p207_p3 = scmp.lt.s32.totalorder %s205_s10, %s201_s9 }
  0x2d   :  { %p208_p4 = por %p207_p3, %p206_p2 }
  0x2f   :  { %p209_p5 = pnand %p208_p4, %p202_p1 }
  0x31   :  { %212 = shalt.err (!%p209_p5)
}
  0x32   :  { %117 = dma.vmem_to_hbm [thread:$0]  %s115_s26, 16, %s283_s4, [#allocation7]  }
  0x33   :  { %223 = dma.done.wait [#allocation4], 16  }
  0x34   :  { %224 = vsyncadd [#allocation4], 4294967280 }
  0x35   :  { %225 = dma.done.wait [#allocation7], 32  }
  0x36   :  { %226 = vsyncadd [#allocation7], 4294967264 }
  0x37   :  { %127 = vsyncpa [#allocation3], 1 }
  0x38   :  { %128 = vsyncpa [#allocation4], 1 }
  0x39   :  { %129 = vsyncpa [#allocation7], 1 }

</bundles_post_ra>
